<compile_context>
chip_gen: v7x
topology: tpu7x:2x2x1
jax: 0.10.0
libtpu: 0.0.40
codegen_flags: <defaults>
</compile_context>

<pallas_src>
import jax
import jax.numpy as jnp
from jax.experimental import pallas as pl
from jax.experimental.pallas import tpu as pltpu

OTHER = 0.5  # the `other` addend from the PyTorch module (scalar, deterministic)

_VMEM_BUDGET = 40 << 20  # conservative: plan must also fit v7x (64 MiB VMEM/TC)


def _round_up(x, m):
    return (x + m - 1) // m * m


def _simple_kernel(x_ref, w_ref, b_ref, o_ref):
    # x_ref: (tm, K) VMEM
    # w_ref: (K, tn) VMEM  (pre-transposed weight, lane-dense RHS)
    # b_ref: (1, tn) VMEM  (bias + OTHER folded)
    # o_ref: (tm, tn) VMEM
    acc = jnp.dot(x_ref[...], w_ref[...], preferred_element_type=jnp.float32)
    o_ref[...] = jnp.maximum(acc + b_ref[...], 0.0).astype(o_ref.dtype)


def _ktiled_kernel(x_ref, w_ref, b_ref, o_ref, acc_ref):
    # Same as above but with a K grid axis (last, 'arbitrary') and an f32
    # accumulator that stays resident across the K steps (P3 pattern).
    k = pl.program_id(2)

    @pl.when(k == 0)
    def _():
        acc_ref[...] = jnp.zeros_like(acc_ref)

    acc_ref[...] += jnp.dot(x_ref[...], w_ref[...],
                            preferred_element_type=jnp.float32)

    @pl.when(k == pl.num_programs(2) - 1)
    def _():
        o_ref[...] = jnp.maximum(acc_ref[...] + b_ref[...],
                                 0.0).astype(o_ref.dtype)


def _footprint_bytes(tm, tk, tn, k_tiled):
    # Conservative: x and out tiles double-buffered, weight/bias counted with
    # 2 buffers (Buffered(1) on constant-index blocks only adds headroom).
    x_bytes = 2 * tm * tk * 4
    o_bytes = 2 * tm * tn * 4
    w_bytes = 2 * tk * tn * 4
    b_bytes = 2 * tn * 4
    acc_bytes = tm * tn * 4 if k_tiled else 0
    return x_bytes + o_bytes + w_bytes + b_bytes + acc_bytes


def _choose_tiles(M, K, N_pad):
    # Row tile: single step only for genuinely small M; keep >= 2 row tiles for
    # medium M so both v7x TensorCores get work; 512-row tiles for large M.
    if M <= 256:
        tm = _round_up(max(M, 8), 8)
    elif M <= 1024:
        tm = 256
    else:
        tm = 512
    # Prefer no K tiling (full K block) and full-N residency; shrink tn first,
    # then tk, until the footprint fits the (v7x-safe) VMEM budget.
    tk_opts = [K] + [c for c in (2048, 1024, 512, 256, 128) if c < K]
    tn_opts = [N_pad] + [c for c in (4096, 2048, 1024, 512, 256, 128)
                         if c < N_pad]
    for tk in tk_opts:
        for tn in tn_opts:
            if _footprint_bytes(tm, tk, tn, tk != K) <= _VMEM_BUDGET:
                return tm, tk, tn
    return tm, 128, 128  # last resort (never reached for sane shapes)


def linear_add_relu(x, weight, bias, other=OTHER, tiles=None):
    """x: (..., K) f32; weight: (N, K) (PyTorch layout); bias: (N,) f32.
    Returns relu(x @ weight.T + bias + other), shape (..., N)."""
    *lead, K = x.shape
    N = weight.shape[0]
    M = 1
    for d in lead:
        M *= d

    x2d = x.reshape(M, K)
    N_pad = _round_up(N, 128)  # lane-dense output -> unmasked stores

    if tiles is None:
        tm, tk, tn = _choose_tiles(M, K, N_pad)
    else:
        tm, tk, tn = tiles  # test hook: force a specific tiling

    k_tiled = tk != K
    K_pad = _round_up(K, tk) if k_tiled else K
    M_pad = _round_up(M, tm)

    # One-time transpose OUTSIDE the kernel hot path: (N, K) -> (K, N).
    # (In a real model the parameter would be stored pre-transposed.)
    wt = weight.T
    b = bias.reshape(1, N).astype(jnp.float32) + jnp.float32(other)  # fold +other

    # Pad only when actually needed (avoids extra HBM copies when aligned).
    if M_pad != M or K_pad != K:
        x2d = jnp.pad(x2d, ((0, M_pad - M), (0, K_pad - K)))
    if K_pad != K or N_pad != N:
        wt = jnp.pad(wt, ((0, K_pad - K), (0, N_pad - N)))
    if N_pad != N:
        b = jnp.pad(b, ((0, 0), (0, N_pad - N)))

    gm = M_pad // tm
    gn = N_pad // tn
    gk = K_pad // tk

    cost = pl.CostEstimate(
        flops=2 * M_pad * N_pad * K_pad,
        transcendentals=0,
        bytes_accessed=4 * (M_pad * K_pad + K_pad * N_pad + N_pad
                            + M_pad * N_pad))

    vmem_limit = int(min(_footprint_bytes(tm, tk, tn, k_tiled) + (8 << 20),
                         64 << 20))

    if not k_tiled:
        # Weight / bias are fully resident (constant block index) only when
        # there is a single N block; then a single pipeline buffer suffices.
        if gn == 1:
            w_spec = pl.BlockSpec((K, tn), lambda i, j: (0, j),
                                  pipeline_mode=pl.Buffered(1))
            b_spec = pl.BlockSpec((1, tn), lambda i, j: (0, j),
                                  pipeline_mode=pl.Buffered(1))
        else:
            w_spec = pl.BlockSpec((K, tn), lambda i, j: (0, j))
            b_spec = pl.BlockSpec((1, tn), lambda i, j: (0, j))

        out2d = pl.pallas_call(
            _simple_kernel,
            out_shape=jax.ShapeDtypeStruct((M_pad, N_pad), x.dtype),
            grid_spec=pltpu.PrefetchScalarGridSpec(
                num_scalar_prefetch=0,
                grid=(gm, gn),
                in_specs=[
                    pl.BlockSpec((tm, K), lambda i, j: (i, 0)),  # x row tile
                    w_spec,                                      # (K, tn) weight
                    b_spec,                                      # (1, tn) bias+other
                ],
                out_specs=pl.BlockSpec((tm, tn), lambda i, j: (i, j)),
            ),
            compiler_params=pltpu.CompilerParams(
                dimension_semantics=("parallel", "parallel"),
                vmem_limit_bytes=vmem_limit),
            cost_estimate=cost,
        )(x2d, wt, b)
    else:
        out2d = pl.pallas_call(
            _ktiled_kernel,
            out_shape=jax.ShapeDtypeStruct((M_pad, N_pad), x.dtype),
            grid_spec=pltpu.PrefetchScalarGridSpec(
                num_scalar_prefetch=0,
                grid=(gm, gn, gk),
                in_specs=[
                    pl.BlockSpec((tm, tk), lambda i, j, k: (i, k)),
                    pl.BlockSpec((tk, tn), lambda i, j, k: (k, j)),
                    pl.BlockSpec((1, tn), lambda i, j, k: (0, j)),
                ],
                out_specs=pl.BlockSpec((tm, tn), lambda i, j, k: (i, j)),
                scratch_shapes=[pltpu.VMEM((tm, tn), jnp.float32)],
            ),
            compiler_params=pltpu.CompilerParams(
                dimension_semantics=("parallel", "parallel", "arbitrary"),
                vmem_limit_bytes=vmem_limit),
            cost_estimate=cost,
        )(x2d, wt, b)

    out = out2d
    if M_pad != M or N_pad != N:
        # Padded rows/cols hold relu(bias+other)/relu(other) values; slice them
        # away.  Skipped entirely when shapes are already aligned.
        out = out[:M, :N]
    return out.reshape(*lead, N)


if __name__ == "__main__":
    key = jax.random.PRNGKey(0)
    kx, kw, kb, kx2, kw2, kb2, kx3, kw3, kb3 = jax.random.split(key, 9)

    # 1) Small aligned problem (no padding, resident weight, Buffered(1) path):
    #    batch=2, seq=64, in_features=32, out_features=128.
    B, S, K, N = 2, 64, 32, 128
    x = jax.random.normal(kx, (B, S, K), dtype=jnp.float32)
    weight = jax.random.normal(kw, (N, K), dtype=jnp.float32) * 0.05  # PyTorch (N, K)
    bias = jax.random.normal(kb, (N,), dtype=jnp.float32) * 0.1

    out = jax.block_until_ready(linear_add_relu(x, weight, bias))
    ref = jnp.maximum(x @ weight.T + bias + OTHER, 0.0)
    assert out.shape == (B, S, N)
    assert jnp.allclose(out, ref, atol=1e-5, rtol=1e-5), "mismatch vs reference"

    # 2) Non-aligned shapes exercise the padding + slice path.
    B2, S2, K2, N2 = 3, 50, 20, 100
    x2 = jax.random.normal(kx2, (B2, S2, K2), dtype=jnp.float32)
    w2 = jax.random.normal(kw2, (N2, K2), dtype=jnp.float32) * 0.05
    b2 = jax.random.normal(kb2, (N2,), dtype=jnp.float32) * 0.1
    out2 = jax.block_until_ready(linear_add_relu(x2, w2, b2))
    ref2 = jnp.maximum(x2 @ w2.T + b2 + OTHER, 0.0)
    assert out2.shape == (B2, S2, N2)
    assert jnp.allclose(out2, ref2, atol=1e-5, rtol=1e-5), "mismatch (padded)"

    # 3) Force a tiny tiling to exercise the K-tiled (accumulator) fallback
    #    path at small shapes: gm=2, gn=2, gk=2.
    M3, K3, N3 = 128, 256, 256
    x3 = jax.random.normal(kx3, (M3, K3), dtype=jnp.float32)
    w3 = jax.random.normal(kw3, (N3, K3), dtype=jnp.float32) * 0.05
    b3 = jax.random.normal(kb3, (N3,), dtype=jnp.float32) * 0.1
    out3 = jax.block_until_ready(
        linear_add_relu(x3, w3, b3, tiles=(64, 128, 128)))
    ref3 = jnp.maximum(x3 @ w3.T + b3 + OTHER, 0.0)
    assert out3.shape == (M3, N3)
    assert jnp.allclose(out3, ref3, atol=1e-4, rtol=1e-4), "mismatch (k-tiled)"

    print("KERNEL_OK")
</pallas_src>

<mosaic_0001>
module attributes {stable_mosaic.version = 11 : i64} {
  func.func @_simple_kernel(%arg0: i32, %arg1: i32, %arg2: memref<128x32xf32, #tpu.memory_space<vmem>>, %arg3: memref<32x128xf32, #tpu.memory_space<vmem>>, %arg4: memref<1x128xf32, #tpu.memory_space<vmem>>, %arg5: memref<128x128xf32, #tpu.memory_space<vmem>>) attributes {dimension_semantics = [#tpu.dimension_semantics<parallel>, #tpu.dimension_semantics<parallel>], iteration_bounds = array<i64: 1, 1>, scalar_prefetch = 0 : i64, scratch_operands = 0 : i64, tpu.core_type = #tpu.core_type<tc>, window_params = [{transform_indices = @transform_0, window_bounds = array<i64: 128, 32>}, {pipeline_mode = #tpu.pipeline_mode<synchronous>, transform_indices = @transform_1, window_bounds = array<i64: 32, 128>}, {pipeline_mode = #tpu.pipeline_mode<synchronous>, transform_indices = @transform_2, window_bounds = array<i64: 1, 128>}, {transform_indices = @transform_3, window_bounds = array<i64: 128, 128>}]} {
    %c0 = arith.constant 0 : index
    %c0_0 = arith.constant 0 : index
    %0 = vector.load %arg2[%c0, %c0_0] : memref<128x32xf32, #tpu.memory_space<vmem>>, vector<128x32xf32>
    %c0_1 = arith.constant 0 : index
    %c0_2 = arith.constant 0 : index
    %1 = vector.load %arg3[%c0_1, %c0_2] : memref<32x128xf32, #tpu.memory_space<vmem>>, vector<32x128xf32>
    %cst = arith.constant dense<0.000000e+00> : vector<128x128xf32>
    %2 = tpu.matmul %0, %1, %cst {dimension_numbers = #tpu.dot_dimension_numbers<[1], [0], [0], [1], [0, 0, 1, 1], [], []>} : vector<128x32xf32>, vector<32x128xf32>, vector<128x128xf32> -> vector<128x128xf32>
    %c0_3 = arith.constant 0 : index
    %c0_4 = arith.constant 0 : index
    %3 = vector.load %arg4[%c0_3, %c0_4] : memref<1x128xf32, #tpu.memory_space<vmem>>, vector<1x128xf32>
    %4 = vector.broadcast %3 : vector<1x128xf32> to vector<128x128xf32>
    %5 = arith.addf %2, %4 : vector<128x128xf32>
    %cst_5 = arith.constant 0.000000e+00 : f32
    %6 = vector.broadcast %cst_5 : f32 to vector<128x128xf32>
    %7 = arith.maximumf %5, %6 : vector<128x128xf32>
    %c0_6 = arith.constant 0 : index
    %c0_7 = arith.constant 0 : index
    %8 = vector.load %arg5[%c0_6, %c0_7] : memref<128x128xf32, #tpu.memory_space<vmem>>, vector<128x128xf32>
    tpu.vector_store %arg5[%c0_6, %c0_7], %7 {strides = array<i32>} : memref<128x128xf32, #tpu.memory_space<vmem>>, vector<128x128xf32>,
    return
  }
  func.func @transform_0(%arg0: i32, %arg1: i32) -> (i32, i32) {
    %c0_i32 = arith.constant 0 : i32
    %c0_i32_0 = arith.constant 0 : i32
    return %arg0, %c0_i32 : i32, i32
  }
  func.func @transform_1(%arg0: i32, %arg1: i32) -> (i32, i32) {
    %c0_i32 = arith.constant 0 : i32
    %c0_i32_0 = arith.constant 0 : i32
    return %c0_i32, %arg1 : i32, i32
  }
  func.func @transform_2(%arg0: i32, %arg1: i32) -> (i32, i32) {
    %c0_i32 = arith.constant 0 : i32
    %c0_i32_0 = arith.constant 0 : i32
    return %c0_i32, %arg1 : i32, i32
  }
  func.func @transform_3(%arg0: i32, %arg1: i32) -> (i32, i32) {
    %c0_i32 = arith.constant 0 : i32
    return %arg0, %arg1 : i32, i32
  }
}

</mosaic_0001>

<bundles_post_ra>
// kernel: tpu_custom_call.1
= control target key start
LH: loop header
LB: loop body
LE: loop exit
PB: predicated region body
PF: predicated region fallthrough
CT: control target
= control target key end

     0   :  { %vm42_vm0 = vcmask 261120   ;;  %s506_s0 = inlined_call_operand.vmem [shape: f32[128,32], index: 0, kind: input, shape index: {}]   ;;  %s507_s1 = inlined_call_operand.vmem [shape: f32[32,128], index: 1, kind: input, shape index: {}]   ;;  %s508_s2 = inlined_call_operand.vmem [shape: f32[1,128], index: 2, kind: input, shape index: {}]   ;;  %s509_s3 = inlined_call_operand.hbm [shape: f32[128,128], index: 3, kind: output, shape index: {}]  }
   0x1   :  { %v31_v0 = vld [vmem:[%s507_s1] sm:$0xff]  ;;  %v32_v1 = vld [vmem:[%s507_s1 + $0x8] sm:$0xff]  ;;  %v33_v2 = vld [vmem:[%s507_s1 + $0x10] sm:$0xff] }
   0x2   :  { %v353_v3 = vpack.c.bf16 %v32_v1, %v31_v0  ;;  %v34_v4 = vld [vmem:[%s507_s1 + $0x18] sm:$0xff]  ;;  %v15_v5 = vld [vmem:[%s506_s0] sm:$0xff] }
   0x3   :  { %v23_v6 = vld [vmem:[%s506_s0 + $0x40] sm:$0xff]  ;;  %v357_v7 = vpack.c.bf16 %v34_v4, %v33_v2  ;;  %329 = vmatprep.mubr.msk.f32.mxu0 %vm42_vm0, %v15_v5 }
   0x4   :  { %341 = vmatprep.mubr.msk.f32.mxu1 %vm42_vm0, %v23_v6  ;;  %354 = vmatprep.subr.bf16.mxu0 %v353_v3 }
   0x5   :  { %361 = vmatprep.subr.bf16.mxu1 %v353_v3  ;;  %356 = vmatpush3.bf16.msra.mxu0 %v353_v3 }
   0x6   :  { %363 = vmatpush3.bf16.msra.mxu1 %v353_v3  ;;  %358 = vmatprep.subr.bf16.mxu0 %v357_v7 }
   0x7   :  { %362 = vmatprep.subr.bf16.mxu1 %v357_v7 }
   0x8   :  { %8 = vsyncpa [#allocation3], 0  ;;  %v16_v8 = vld [vmem:[%s506_s0 + $0x8] sm:$0xff]  ;;  %v17_v10 = vld [vmem:[%s506_s0 + $0x10] sm:$0xff] }
   0x9   :  { %360 = vmatpush3.bf16.msra.mxu0 %v357_v7  ;;  %v24_v9 = vld [vmem:[%s506_s0 + $0x48] sm:$0xff]  ;;  %v25_v11 = vld [vmem:[%s506_s0 + $0x50] sm:$0xff]  ;;  %v18_v12 = vld [vmem:[%s506_s0 + $0x18] sm:$0xff] }
   0xa   :  { %364 = vmatpush3.bf16.msra.mxu1 %v357_v7  ;;  %v26_v13 = vld [vmem:[%s506_s0 + $0x58] sm:$0xff]  ;;  %v19_v14 = vld [vmem:[%s506_s0 + $0x20] sm:$0xff]  ;;  %v20_v16 = vld [vmem:[%s506_s0 + $0x28] sm:$0xff] }
   0xb   :  { %v27_v15 = vld [vmem:[%s506_s0 + $0x60] sm:$0xff]  ;;  %v28_v17 = vld [vmem:[%s506_s0 + $0x68] sm:$0xff]  ;;  %v21_v18 = vld [vmem:[%s506_s0 + $0x30] sm:$0xff] }
   0xc   :  { %330 = vmatmul.mubr.msk.f32.vlgmr.msra.gmra.mrb[0].mxu0 %vm42_vm0, %v16_v8  ;;  %v29_v19 = vld [vmem:[%s506_s0 + $0x70] sm:$0xff]  ;;  %v22_v20 = vld [vmem:[%s506_s0 + $0x38] sm:$0xff]  ;;  %v284_v22 = vld [vmem:[%s508_s2] ss:$0 sm:$0xff] }
   0xd   :  { %342 = vmatmul.mubr.msk.f32.vlgmr.msra.gmra.mrb[0].mxu1 %vm42_vm0, %v24_v9  ;;  %332 = vmatprep.mubr.msk.f32.mxu0 %vm42_vm0, %v17_v10  ;;  %v30_v21 = vld [vmem:[%s506_s0 + $0x78] sm:$0xff]  ;;  %s392_s0 = smov [#allocation2]  }
   0xe   :  { %344 = vmatprep.mubr.msk.f32.mxu1 %vm42_vm0, %v25_v11  ;;  %s273_s2 = sshll.u32 %s392_s0, 4  ;;  %s274_s2 = int_to_ptr.vmem [resolvable:$true] %s273_s2 }
   0xf   :  { %s368_s25 = scalar_lea.vmem %s274_s2, 2048  ;;  %p373_p1 = scmp.lt.s32.totalorder %s274_s2, %s274_s2 }
  0x10   :  { %333 = vmatmul.mubr.msk.f32.gmra.mrb[2].mxu0 %vm42_vm0, %v18_v12  ;;  %p369_p0 = scmp.ne.s32.totalorder %s274_s2, %s368_s25  ;;  %p374_p2 = scmp.lt.s32.totalorder %s368_s25, %s368_s25 }
  0x11   :  { %345 = vmatmul.mubr.msk.f32.gmra.mrb[2].mxu1 %vm42_vm0, %v26_v13  ;;  %335 = vmatprep.mubr.msk.f32.mxu0 %vm42_vm0, %v19_v14 }
  0x12   :  { %347 = vmatprep.mubr.msk.f32.mxu1 %vm42_vm0, %v27_v15  ;;  %p375_p3 = por %p374_p2, %p373_p1 }
  0x14   :  { %336 = vmatmul.mubr.msk.f32.gmra.mrb[4].mxu0 %vm42_vm0, %v20_v16  ;;  %p376_p4 = pnand %p375_p3, %p369_p0 }
  0x15   :  { %348 = vmatmul.mubr.msk.f32.gmra.mrb[4].mxu1 %vm42_vm0, %v28_v17  ;;  %338 = vmatprep.mubr.msk.f32.mxu0 %vm42_vm0, %v21_v18 }
  0x16   :  { %350 = vmatprep.mubr.msk.f32.mxu1 %vm42_vm0, %v29_v19 }
  0x18   :  { %339 = vmatmul.mubr.msk.f32.gmra.mrb[6].mxu0 %vm42_vm0, %v22_v20 }
  0x19   :  { %351 = vmatmul.mubr.msk.f32.gmra.mrb[6].mxu1 %vm42_vm0, %v30_v21 }
  0xdf   :  { %v331_v23 = vpop.f32.mrb[0].mxu0 }
  0xe0   :  { %v343_v24 = vpop.f32.mrb[0].mxu1  ;;  %v163_v25 = vadd.f32 %v331_v23, %v284_v22  ;;  %v157_v27 = vpop.f32.mrb[1].mxu0 }
  0xe1   :  { %v203_v26 = vadd.f32 %v343_v24, %v284_v22  ;;  %v197_v28 = vpop.f32.mrb[1].mxu1  ;;  %v158_v29 = vadd.f32 %v284_v22, %v157_v27 }
  0xe2   :  { %v198_v30 = vadd.f32 %v284_v22, %v197_v28  ;;  %v237_v31 = vmax.f32 %v163_v25, 0.0 }
  0xe3   :  { %v245_v32 = vmax.f32 %v203_v26, 0.0  ;;  %v236_v33 = vmax.f32 %v158_v29, 0.0  ;;  %v334_v35 = vpop.f32.mrb[2].mxu0 }
  0xe4   :  { %v244_v34 = vmax.f32 %v198_v30, 0.0  ;;  %v346_v36 = vpop.f32.mrb[2].mxu1  ;;  %253 = vst [vmem:[#allocation2 + $0x8] sm:$0xff] %v237_v31  ;;  %v173_v37 = vadd.f32 %v334_v35, %v284_v22  ;;  %v167_v39 = vpop.f32.mrb[3].mxu0 }
  0xe5   :  { %261 = vst [vmem:[#allocation2 + $0x48] sm:$0xff] %v245_v32  ;;  %v213_v38 = vadd.f32 %v346_v36, %v284_v22  ;;  %v207_v40 = vpop.f32.mrb[3].mxu1  ;;  %252 = vst [vmem:[#allocation2] sm:$0xff] %v236_v33  ;;  %v168_v41 = vadd.f32 %v284_v22, %v167_v39 }
  0xe6   :  { %260 = vst [vmem:[#allocation2 + $0x40] sm:$0xff] %v244_v34  ;;  %v208_v42 = vadd.f32 %v284_v22, %v207_v40  ;;  %v239_v43 = vmax.f32 %v173_v37, 0.0 }
  0xe7   :  { %v247_v44 = vmax.f32 %v213_v38, 0.0  ;;  %v238_v45 = vmax.f32 %v168_v41, 0.0  ;;  %v337_v47 = vpop.f32.mrb[4].mxu0 }
  0xe8   :  { %v246_v46 = vmax.f32 %v208_v42, 0.0  ;;  %v349_v48 = vpop.f32.mrb[4].mxu1  ;;  %255 = vst [vmem:[#allocation2 + $0x18] sm:$0xff] %v239_v43  ;;  %v183_v49 = vadd.f32 %v337_v47, %v284_v22  ;;  %v177_v51 = vpop.f32.mrb[5].mxu0 }
  0xe9   :  { %263 = vst [vmem:[#allocation2 + $0x58] sm:$0xff] %v247_v44  ;;  %v223_v50 = vadd.f32 %v349_v48, %v284_v22  ;;  %v217_v52 = vpop.f32.mrb[5].mxu1  ;;  %254 = vst [vmem:[#allocation2 + $0x10] sm:$0xff] %v238_v45  ;;  %v178_v53 = vadd.f32 %v284_v22, %v177_v51 }
  0xea   :  { %262 = vst [vmem:[#allocation2 + $0x50] sm:$0xff] %v246_v46  ;;  %v218_v54 = vadd.f32 %v284_v22, %v217_v52  ;;  %v241_v55 = vmax.f32 %v183_v49, 0.0 }
  0xeb   :  { %v249_v56 = vmax.f32 %v223_v50, 0.0  ;;  %v240_v57 = vmax.f32 %v178_v53, 0.0  ;;  %v340_v59 = vpop.f32.mrb[6].mxu0 }
  0xec   :  { %v248_v58 = vmax.f32 %v218_v54, 0.0  ;;  %v352_v60 = vpop.f32.mrb[6].mxu1  ;;  %257 = vst [vmem:[#allocation2 + $0x28] sm:$0xff] %v241_v55  ;;  %v193_v61 = vadd.f32 %v340_v59, %v284_v22  ;;  %v187_v63 = vpop.f32.mrb[7].mxu0 }
  0xed   :  { %265 = vst [vmem:[#allocation2 + $0x68] sm:$0xff] %v249_v56  ;;  %v233_v62 = vadd.f32 %v352_v60, %v284_v22  ;;  %v227_v0 = vpop.f32.mrb[7].mxu1  ;;  %256 = vst [vmem:[#allocation2 + $0x20] sm:$0xff] %v240_v57  ;;  %v188_v1 = vadd.f32 %v284_v22, %v187_v63 }
  0xee   :  { %264 = vst [vmem:[#allocation2 + $0x60] sm:$0xff] %v248_v58  ;;  %v228_v2 = vadd.f32 %v284_v22, %v227_v0  ;;  %v243_v3 = vmax.f32 %v193_v61, 0.0 }
  0xef   :  { %v251_v4 = vmax.f32 %v233_v62, 0.0  ;;  %v242_v5 = vmax.f32 %v188_v1, 0.0 }
  0xf0   :  { %v250_v6 = vmax.f32 %v228_v2, 0.0  ;;  %259 = vst [vmem:[#allocation2 + $0x38] sm:$0xff] %v243_v3 }
  0xf1   :  { %267 = vst [vmem:[#allocation2 + $0x78] sm:$0xff] %v251_v4  ;;  %258 = vst [vmem:[#allocation2 + $0x30] sm:$0xff] %v242_v5 }
  0xf2   :  { %266 = vst [vmem:[#allocation2 + $0x70] sm:$0xff] %v250_v6 }
  0xf3   :  { %379 = shalt.err (!%p376_p4)
}
  0xf4   :  { %s380_s28 = scalar_lea.hbm %s509_s3, 2048 }
  0xf5   :  { %p381_p5 = scmp.ne.s32.totalorder %s509_s3, %s380_s28  ;;  %p384_p6 = scmp.lt.u32.totalorder %s380_s28, %s509_s3 }
  0xf7   :  { %p386_p7 = pnand %p384_p6, %p381_p5 }
  0xf9   :  { %389 = shalt.err (!%p386_p7)
}
  0xfa   :  { %s393_s6 = smov 128   ;;  %s394_s7 = smov 8  }
  0xfb   :  { %279 = dma.vmem_to_hbm [thread:$0]  %s274_s2, 2048, %s509_s3, [#allocation3], %s393_s6, %s393_s6, %s394_s7  }
  0xfc   :  { %390 = dma.done.wait [#allocation3], 2048  }
  0xfd   :  { %391 = vsyncadd [#allocation3], 4294965248 }
  0xfe   :  { %283 = vsyncpa [#allocation3], 1 }

</bundles_post_ra>
